<compile_context>
chip_gen: v5e
topology: v5e:2x2
jax: 0.10.0
libtpu: 0.0.40
codegen_flags: <defaults>
</compile_context>

<pallas_src>
import math

import jax
import jax.numpy as jnp
from jax.experimental import pallas as pl
from jax.experimental.pallas import tpu as pltpu

_MASK_VALUE = -1e30

_SUBLANE_TILES = (512, 256, 128, 64, 32, 16)   # >=16 so bf16 blocks stay legal
_LANE_TILES = (512, 256, 128)


def _pick_tile(n, candidates):
    # TODO(synk): pad + masked edge handling for dims that neither match a
    # candidate nor are small enough for a full-dim block.
    for c in candidates:
        if c <= n and n % c == 0:
            return c
    return n


# ---------------------------------------------------------------------------
# Linear (matmul + bias [+ fused residual]) kernels
# ---------------------------------------------------------------------------
def _make_linear_kernel(has_residual, single_k):
    """MXU matmul with f32 accumulation, bias add, optional residual add."""
    if single_k:
        def kernel(*refs):
            if has_residual:
                x_ref, w_ref, b_ref, r_ref, o_ref = refs
            else:
                x_ref, w_ref, b_ref, o_ref = refs
                r_ref = None
            acc = jnp.dot(x_ref[...], w_ref[...],
                          preferred_element_type=jnp.float32)
            acc = acc + b_ref[...]
            if r_ref is not None:
                acc = acc + r_ref[...].astype(jnp.float32)
            o_ref[...] = acc.astype(o_ref.dtype)
        return kernel

    def kernel(*refs):
        if has_residual:
            x_ref, w_ref, b_ref, r_ref, o_ref, acc_ref = refs
        else:
            x_ref, w_ref, b_ref, o_ref, acc_ref = refs
            r_ref = None

        @pl.when(pl.program_id(2) == 0)
        def _():
            acc_ref[...] = jnp.zeros(acc_ref.shape, acc_ref.dtype)

        acc_ref[...] += jnp.dot(x_ref[...], w_ref[...],
                                preferred_element_type=jnp.float32)

        @pl.when(pl.program_id(2) == pl.num_programs(2) - 1)
        def _():
            acc = acc_ref[...] + b_ref[...]
            if r_ref is not None:
                acc = acc + r_ref[...].astype(jnp.float32)
            o_ref[...] = acc.astype(o_ref.dtype)
    return kernel


def _linear(x, w_t, b, residual=None, out_dtype=None):
    """y = x @ w_t + b (+ residual).  x:(M,K)  w_t:(K,N)  b:(1,N) f32."""
    M, K = x.shape
    N = w_t.shape[1]
    if out_dtype is None:
        out_dtype = x.dtype
    tm = _pick_tile(M, _SUBLANE_TILES)
    tn = _pick_tile(N, _LANE_TILES)
    tk = _pick_tile(K, _LANE_TILES)
    nk = K // tk
    single_k = nk == 1

    in_specs = [
        pl.BlockSpec((tm, tk), lambda i, j, k: (i, k)),
        pl.BlockSpec((tk, tn), lambda i, j, k: (k, j)),
        pl.BlockSpec((1, tn), lambda i, j, k: (0, j)),
    ]
    args = [x, w_t, b]
    if residual is not None:
        in_specs.append(pl.BlockSpec((tm, tn), lambda i, j, k: (i, j)))
        args.append(residual)

    return pl.pallas_call(
        _make_linear_kernel(residual is not None, single_k),
        out_shape=jax.ShapeDtypeStruct((M, N), out_dtype),
        grid_spec=pltpu.PrefetchScalarGridSpec(
            num_scalar_prefetch=0,
            grid=(M // tm, N // tn, nk),
            in_specs=in_specs,
            out_specs=pl.BlockSpec((tm, tn), lambda i, j, k: (i, j)),
            scratch_shapes=([] if single_k
                            else [pltpu.VMEM((tm, tn), jnp.float32)]),
        ),
        compiler_params=pltpu.CompilerParams(
            dimension_semantics=("parallel", "parallel", "arbitrary")),
    )(*args)


# ---------------------------------------------------------------------------
# Flash-style attention kernel: whole-E rows, heads sliced in-kernel,
# online softmax over kv tiles (reduction axis last in the grid).
# ---------------------------------------------------------------------------
def _make_attn_kernel(num_heads, head_dim, has_amask, has_kpm, compute_dtype):
    H, D = num_heads, head_dim

    def kernel(*refs):
        q_ref, k_ref, v_ref = refs[0], refs[1], refs[2]
        idx = 3
        amask_ref = None
        kpm_ref = None
        if has_amask:
            amask_ref = refs[idx]
            idx += 1
        if has_kpm:
            kpm_ref = refs[idx]
            idx += 1
        o_ref = refs[idx]
        m_sc, l_sc, acc_sc = refs[idx + 1], refs[idx + 2], refs[idx + 3]

        si = pl.program_id(2)

        @pl.when(si == 0)
        def _():
            m_sc[...] = jnp.full(m_sc.shape, _MASK_VALUE, m_sc.dtype)
            l_sc[...] = jnp.zeros(l_sc.shape, l_sc.dtype)
            acc_sc[...] = jnp.zeros(acc_sc.shape, acc_sc.dtype)

        q = q_ref[0]          # (tl, E)  compute_dtype
        k = k_ref[0]          # (ts, E)
        v = v_ref[0]          # (ts, E)

        # Additive masks are shared by all heads: build them once per step.
        bias = None
        if amask_ref is not None:
            bias = amask_ref[...]                       # (tl, ts) f32
        if kpm_ref is not None:
            kpm = kpm_ref[0]                            # (1, ts) f32
            bias = kpm if bias is None else bias + kpm

        # TODO(synk): bf16 exp (v6e/v7x EUP) not used; exp stays f32 so the
        # same kernel is numerically safe on v5e (no bf16 VPU/EUP).
        for h in range(H):
            lo = h * D
            hi = lo + D
            qh = q[:, lo:hi]                            # (tl, D)
            kh = k[:, lo:hi]                            # (ts, D)
            vh = v[:, lo:hi]                            # (ts, D)
            # softmax scale already folded into the Q projection weights.
            s = jax.lax.dot_general(qh, kh, (((1,), (1,)), ((), ())),
                                    preferred_element_type=jnp.float32)
            if bias is not None:
                s = s + bias
            m_prev = m_sc[h]                            # (tl, 1)
            m_new = jnp.maximum(m_prev, s.max(axis=-1, keepdims=True))
            alpha = jnp.exp(m_prev - m_new)
            p = jnp.exp(s - m_new)
            l_sc[h] = alpha * l_sc[h] + p.sum(axis=-1, keepdims=True)
            acc_sc[h] = alpha * acc_sc[h] + jnp.dot(
                p.astype(compute_dtype), vh,
                preferred_element_type=jnp.float32)
            m_sc[h] = m_new

        @pl.when(si == pl.num_programs(2) - 1)
        def _():
            # TODO(synk): fully-masked rows yield a uniform average over V
            # (finite -1e30 masking) instead of PyTorch's NaN behaviour.
            for h in range(H):
                denom = l_sc[h]
                inv = pl.reciprocal(denom, approx=True)
                inv = inv * (2.0 - denom * inv)         # one Newton step
                o_ref[0, :, h * D:(h + 1) * D] = (
                    acc_sc[h] * inv).astype(o_ref.dtype)

    return kernel


def _attn_q_map(col):
    return lambda b, li, si: (b, li, col)


def _attn_kv_map(col):
    return lambda b, li, si: (b, si, col)


def _attention(q_pack, k_pack, v_pack, amask, kpm, *, embed_dim, num_heads,
               compute_dtype):
    """q/k/v packs are (array, last-dim block column).  Arrays are
    (B, rows, m*E); the column selects which E-wide slab is Q/K/V, which lets
    the kernel consume a fused QKV projection without split copies."""
    q_arr, q_col = q_pack
    k_arr, k_col = k_pack
    v_arr, v_col = v_pack
    E, H = embed_dim, num_heads
    D = E // H
    B, L, _ = q_arr.shape
    S = k_arr.shape[1]
    tl = _pick_tile(L, (256, 128, 64, 32, 16))
    ts = _pick_tile(S, (512, 256, 128))

    in_specs = [
        pl.BlockSpec((1, tl, E), _attn_q_map(q_col)),
        pl.BlockSpec((1, ts, E), _attn_kv_map(k_col)),
        pl.BlockSpec((1, ts, E), _attn_kv_map(v_col)),
    ]
    args = [q_arr, k_arr, v_arr]
    if amask is not None:
        in_specs.append(pl.BlockSpec((tl, ts), lambda b, li, si: (li, si)))
        args.append(amask)
    if kpm is not None:
        in_specs.append(
            pl.BlockSpec((1, 1, ts), lambda b, li, si: (b, 0, si)))
        args.append(kpm)

    kernel = _make_attn_kernel(H, D, amask is not None, kpm is not None,
                               compute_dtype)
    return pl.pallas_call(
        kernel,
        out_shape=jax.ShapeDtypeStruct((B, L, E), compute_dtype),
        grid_spec=pltpu.PrefetchScalarGridSpec(
            num_scalar_prefetch=0,
            grid=(B, L // tl, S // ts),
            in_specs=in_specs,
            out_specs=pl.BlockSpec((1, tl, E), lambda b, li, si: (b, li, 0)),
            scratch_shapes=[
                pltpu.VMEM((H, tl, 1), jnp.float32),   # running max
                pltpu.VMEM((H, tl, 1), jnp.float32),   # running denom
                pltpu.VMEM((H, tl, D), jnp.float32),   # running numerator
            ],
        ),
        compiler_params=pltpu.CompilerParams(
            dimension_semantics=("parallel", "parallel", "arbitrary")),
    )(*args)


# ---------------------------------------------------------------------------
# Mask preparation (no (B, L, S) materialization)
# ---------------------------------------------------------------------------
def _prepare_masks(attn_mask, key_padding_mask, L, S, B):
    amask = None
    if attn_mask is not None:
        # TODO(synk): only the 2-D (L, S) attn_mask form is supported.
        if attn_mask.dtype == jnp.bool_:
            amask = jnp.where(attn_mask, _MASK_VALUE, 0.0)
        else:
            # clamp user -inf so the online softmax never produces NaN
            amask = jnp.maximum(attn_mask.astype(jnp.float32), _MASK_VALUE)
        amask = amask.astype(jnp.float32).reshape(L, S)
    kpm = None
    if key_padding_mask is not None:
        if key_padding_mask.dtype == jnp.bool_:
            kpm = jnp.where(key_padding_mask, _MASK_VALUE, 0.0)
        else:
            kpm = jnp.maximum(key_padding_mask.astype(jnp.float32),
                              _MASK_VALUE)
        kpm = kpm.astype(jnp.float32).reshape(B, 1, S)
    return amask, kpm


# ---------------------------------------------------------------------------
# Module forward (wrapper)
# ---------------------------------------------------------------------------
def multihead_attention_forward(query, key=None, value=None, identity=None,
                                query_pos=None, key_pos=None,
                                attn_mask=None, key_padding_mask=None, *,
                                params, num_heads, batch_first=False,
                                compute_dtype=jnp.bfloat16):
    # ----- module-level defaults (same order as the PyTorch forward) -----
    if key is None:
        key = query
    if value is None:
        value = key
    if identity is None:
        identity = query
    if key_pos is None and query_pos is not None \
            and query_pos.shape == key.shape:
        key_pos = query_pos

    # Pre-projection inputs; shared tensors stay aliased so the projections
    # below can be fused into a single matmul.
    q_in = query if query_pos is None else query + query_pos
    if key is query and key_pos is query_pos:
        k_in = q_in
    elif key_pos is None:
        k_in = key
    else:
        k_in = key + key_pos
    if value is key and key_pos is None:
        v_in = k_in
    elif value is query and query_pos is None:
        v_in = q_in
    else:
        v_in = value

    # ----- convert everything to (batch, seq, E) once (dedup by identity) ---
    cache = {}

    def to_batch_first(x):
        if batch_first:
            return x
        if id(x) not in cache:
            cache[id(x)] = jnp.transpose(x, (1, 0, 2))
        return cache[id(x)]

    q_bf = to_batch_first(q_in)
    k_bf = to_batch_first(k_in)
    v_bf = to_batch_first(v_in)
    ident = to_batch_first(identity)

    B, L, E = q_bf.shape
    S = k_bf.shape[1]
    H = num_heads
    assert E % H == 0
    D = E // H
    cdt = compute_dtype

    w_in = params["in_proj_weight"].astype(jnp.float32)    # (3E, E)
    b_in = params["in_proj_bias"].astype(jnp.float32)      # (3E,)
    w_out = params["out_proj_weight"].astype(jnp.float32)  # (E, E)
    b_out = params["out_proj_bias"].astype(jnp.float32)    # (E,)

    # Fold the 1/sqrt(D) softmax scale into the Q projection (free).
    scale = 1.0 / math.sqrt(D)
    parts = {
        "q": (w_in[:E] * scale, b_in[:E] * scale),
        "k": (w_in[E:2 * E], b_in[E:2 * E]),
        "v": (w_in[2 * E:], b_in[2 * E:]),
    }

    # ----- fused input projections (group q/k/v that share an input) -------
    if q_bf is k_bf and k_bf is v_bf:
        groups = [(q_bf, ("q", "k", "v"))]
    elif q_bf is k_bf:
        groups = [(q_bf, ("q", "k")), (v_bf, ("v",))]
    elif k_bf is v_bf:
        groups = [(q_bf, ("q",)), (k_bf, ("k", "v"))]
    else:
        groups = [(q_bf, ("q",)), (k_bf, ("k",)), (v_bf, ("v",))]

    proj = {}
    for x3, names in groups:
        Bx, R, _ = x3.shape
        w_cat = jnp.concatenate([parts[n][0] for n in names], axis=0)
        b_cat = jnp.concatenate([parts[n][1] for n in names], axis=0)
        y = _linear(x3.reshape(Bx * R, E).astype(cdt),
                    jnp.transpose(w_cat).astype(cdt),
                    b_cat.reshape(1, -1),
                    out_dtype=cdt)
        y3 = y.reshape(Bx, R, len(names) * E)
        if len(names) == 1 or E % 128 == 0:
            # attention BlockSpecs slice the fused projection directly.
            for ci, n in enumerate(names):
                proj[n] = (y3, ci)
        else:
            for ci, n in enumerate(names):
                proj[n] = (y3[:, :, ci * E:(ci + 1) * E], 0)

    amask, kpm = _prepare_masks(attn_mask, key_padding_mask, L, S, B)

    # ----- flash-style attention ------------------------------------------
    # TODO(synk): attn_drop not applied (inference-mode forward).
    attn_out = _attention(proj["q"], proj["k"], proj["v"], amask, kpm,
                          embed_dim=E, num_heads=H, compute_dtype=cdt)

    # ----- output projection with fused identity residual ------------------
    # TODO(synk): proj_drop not applied (inference-mode forward).
    out = _linear(attn_out.reshape(B * L, E),
                  jnp.transpose(w_out).astype(cdt),
                  b_out.reshape(1, E),
                  residual=ident.reshape(B * L, E),
                  out_dtype=query.dtype)
    out = out.reshape(B, L, E)
    if not batch_first:
        out = jnp.transpose(out, (1, 0, 2))
    return out


# ---------------------------------------------------------------------------
# Pure-JAX reference (mirrors torch.nn.MultiheadAttention math)
# ---------------------------------------------------------------------------
def _reference_forward(query, key, value, identity, query_pos, key_pos,
                       attn_mask, key_padding_mask, params, num_heads,
                       batch_first):
    if key is None:
        key = query
    if value is None:
        value = key
    if identity is None:
        identity = query
    if key_pos is None and query_pos is not None \
            and query_pos.shape == key.shape:
        key_pos = query_pos
    q = query + query_pos if query_pos is not None else query
    k = key + key_pos if key_pos is not None else key
    v = value
    if batch_first:
        q = jnp.transpose(q, (1, 0, 2))
        k = jnp.transpose(k, (1, 0, 2))
        v = jnp.transpose(v, (1, 0, 2))
    L, B, E = q.shape
    S = k.shape[0]
    H = num_heads
    D = E // H
    w_in, b_in = params["in_proj_weight"], params["in_proj_bias"]
    w_out, b_out = params["out_proj_weight"], params["out_proj_bias"]
    hp = jax.lax.Precision.HIGHEST

    qp = jnp.einsum("lbe,fe->lbf", q, w_in[:E], precision=hp) + b_in[:E]
    kp = jnp.einsum("sbe,fe->sbf", k, w_in[E:2 * E], precision=hp) \
        + b_in[E:2 * E]
    vp = jnp.einsum("sbe,fe->sbf", v, w_in[2 * E:], precision=hp) \
        + b_in[2 * E:]

    qh = qp.reshape(L, B, H, D).transpose(1, 2, 0, 3)
    kh = kp.reshape(S, B, H, D).transpose(1, 2, 0, 3)
    vh = vp.reshape(S, B, H, D).transpose(1, 2, 0, 3)

    scores = jnp.einsum("bhld,bhsd->bhls", qh, kh, precision=hp) \
        / math.sqrt(D)
    if attn_mask is not None:
        if attn_mask.dtype == jnp.bool_:
            am = jnp.where(attn_mask, _MASK_VALUE, 0.0)
        else:
            am = attn_mask
        scores = scores + am.astype(jnp.float32).reshape(1, 1, L, S)
    if key_padding_mask is not None:
        if key_padding_mask.dtype == jnp.bool_:
            kpm = jnp.where(key_padding_mask, _MASK_VALUE, 0.0)
        else:
            kpm = key_padding_mask
        scores = scores + kpm.astype(jnp.float32).reshape(B, 1, 1, S)
    p = jax.nn.softmax(scores, axis=-1)
    o = jnp.einsum("bhls,bhsd->bhld", p, vh, precision=hp)
    o = o.transpose(2, 0, 1, 3).reshape(L, B, E)
    o = jnp.einsum("lbe,fe->lbf", o, w_out, precision=hp) + b_out
    if batch_first:
        o = jnp.transpose(o, (1, 0, 2))
    return identity + o


# ---------------------------------------------------------------------------
# Test
# ---------------------------------------------------------------------------
def _rel_err(out, ref):
    out = out.astype(jnp.float32)
    ref = ref.astype(jnp.float32)
    return float(jnp.linalg.norm(out - ref) / (jnp.linalg.norm(ref) + 1e-12))


def _run_case(name, *, params, num_heads, batch_first, query, key=None,
              value=None, identity=None, query_pos=None, key_pos=None,
              attn_mask=None, key_padding_mask=None):
    kwargs = dict(key=key, value=value, identity=identity,
                  query_pos=query_pos, key_pos=key_pos,
                  attn_mask=attn_mask, key_padding_mask=key_padding_mask)
    ref = _reference_forward(query, key, value, identity, query_pos, key_pos,
                             attn_mask, key_padding_mask, params, num_heads,
                             batch_first)

    # strict-math run (f32 MXU operands)
    out = multihead_attention_forward(
        query, params=params, num_heads=num_heads, batch_first=batch_first,
        compute_dtype=jnp.float32, **kwargs)
    out = jax.block_until_ready(out)
    assert out.shape == ref.shape, (name, out.shape, ref.shape)
    assert out.dtype == query.dtype, (name, out.dtype)
    err = _rel_err(out, ref)
    assert err < 2e-2, (name, "f32", err)

    # default performance path (bf16 MXU operands, f32 accumulation)
    out_bf = multihead_attention_forward(
        query, params=params, num_heads=num_heads, batch_first=batch_first,
        **kwargs)
    out_bf = jax.block_until_ready(out_bf)
    assert out_bf.shape == ref.shape and out_bf.dtype == query.dtype
    err_bf = _rel_err(out_bf, ref)
    assert err_bf < 5e-2, (name, "bf16", err_bf)


if __name__ == "__main__":
    root = jax.random.PRNGKey(0)
    ks = jax.random.split(root, 16)

    def make_params(rng, E):
        k1, k2, k3, k4 = jax.random.split(rng, 4)
        return dict(
            in_proj_weight=jax.random.normal(k1, (3 * E, E), jnp.float32)
            / math.sqrt(E),
            in_proj_bias=jax.random.normal(k2, (3 * E,), jnp.float32) * 0.1,
            out_proj_weight=jax.random.normal(k3, (E, E), jnp.float32)
            / math.sqrt(E),
            out_proj_bias=jax.random.normal(k4, (E,), jnp.float32) * 0.1,
        )

    # Case 1: self-attention, batch_first=False, query_pos, no masks.
    # (fused Q+K projection, separate V, seq-first layout)
    E1, H1, L1, B1 = 32, 4, 8, 2
    p1 = make_params(ks[0], E1)
    q1 = jax.random.normal(ks[1], (L1, B1, E1), jnp.float32)
    qp1 = jax.random.normal(ks[2], (L1, B1, E1), jnp.float32)
    _run_case("case1_self_seqfirst", params=p1, num_heads=H1,
              batch_first=False, query=q1, query_pos=qp1)

    # Case 2: cross-attention, batch_first=True, float attn_mask + bool
    # key_padding_mask (separate projections, both mask paths).
    E2, H2, L2, S2, B2 = 32, 4, 8, 16, 2
    p2 = make_params(ks[3], E2)
    q2 = jax.random.normal(ks[4], (B2, L2, E2), jnp.float32)
    k2 = jax.random.normal(ks[5], (B2, S2, E2), jnp.float32)
    qp2 = jax.random.normal(ks[6], (B2, L2, E2), jnp.float32)
    kp2 = jax.random.normal(ks[7], (B2, S2, E2), jnp.float32)
    am2 = jax.random.normal(ks[8], (L2, S2), jnp.float32) * 0.5
    kpm2 = jnp.zeros((B2, S2), jnp.bool_).at[:, -3:].set(True)
    _run_case("case2_cross_masks", params=p2, num_heads=H2, batch_first=True,
              query=q2, key=k2, query_pos=qp2, key_pos=kp2, attn_mask=am2,
              key_padding_mask=kpm2)

    # Case 3: self-attention, batch_first=True, no pos, E % 128 == 0
    # (fully fused QKV projection consumed directly by the attention
    # BlockSpecs, multi-K-tile matmul accumulation, zero layout transposes).
    E3, H3, L3, B3 = 384, 6, 16, 2
    p3 = make_params(ks[9], E3)
    q3 = jax.random.normal(ks[10], (B3, L3, E3), jnp.float32)
    _run_case("case3_self_fusedqkv", params=p3, num_heads=H3,
              batch_first=True, query=q3)

    print("KERNEL_OK")
</pallas_src>

<mosaic_0001>
module attributes {stable_mosaic.version = 11 : i64} {
  func.func @kernel(%arg0: i32, %arg1: i32, %arg2: i32, %arg3: memref<16x32xf32, #tpu.memory_space<vmem>>, %arg4: memref<32x64xf32, #tpu.memory_space<vmem>>, %arg5: memref<1x64xf32, #tpu.memory_space<vmem>>, %arg6: memref<16x64xf32, #tpu.memory_space<vmem>>) attributes {dimension_semantics = [#tpu.dimension_semantics<parallel>, #tpu.dimension_semantics<parallel>, #tpu.dimension_semantics<arbitrary>], iteration_bounds = array<i64: 1, 1, 1>, scalar_prefetch = 0 : i64, scratch_operands = 0 : i64, tpu.core_type = #tpu.core_type<tc>, window_params = [{transform_indices = @transform_0, window_bounds = array<i64: 16, 32>}, {transform_indices = @transform_1, window_bounds = array<i64: 32, 64>}, {transform_indices = @transform_2, window_bounds = array<i64: 1, 64>}, {transform_indices = @transform_3, window_bounds = array<i64: 16, 64>}]} {
    %c0 = arith.constant 0 : index
    %c0_0 = arith.constant 0 : index
    %0 = vector.load %arg3[%c0, %c0_0] : memref<16x32xf32, #tpu.memory_space<vmem>>, vector<16x32xf32>
    %c0_1 = arith.constant 0 : index
    %c0_2 = arith.constant 0 : index
    %1 = vector.load %arg4[%c0_1, %c0_2] : memref<32x64xf32, #tpu.memory_space<vmem>>, vector<32x64xf32>
    %cst = arith.constant dense<0.000000e+00> : vector<16x64xf32>
    %2 = tpu.matmul %0, %1, %cst {dimension_numbers = #tpu.dot_dimension_numbers<[1], [0], [0], [1], [0, 0, 1, 1], [], []>} : vector<16x32xf32>, vector<32x64xf32>, vector<16x64xf32> -> vector<16x64xf32>
    %c0_3 = arith.constant 0 : index
    %c0_4 = arith.constant 0 : index
    %3 = vector.load %arg5[%c0_3, %c0_4] : memref<1x64xf32, #tpu.memory_space<vmem>>, vector<1x64xf32>
    %4 = vector.broadcast %3 : vector<1x64xf32> to vector<16x64xf32>
    %5 = arith.addf %2, %4 : vector<16x64xf32>
    %c0_5 = arith.constant 0 : index
    %c0_6 = arith.constant 0 : index
    %6 = vector.load %arg6[%c0_5, %c0_6] : memref<16x64xf32, #tpu.memory_space<vmem>>, vector<16x64xf32>
    tpu.vector_store %arg6[%c0_5, %c0_6], %5 {strides = array<i32>} : memref<16x64xf32, #tpu.memory_space<vmem>>, vector<16x64xf32>,
    return
  }
  func.func @transform_0(%arg0: i32, %arg1: i32, %arg2: i32) -> (i32, i32) {
    %c0_i32 = arith.constant 0 : i32
    return %arg0, %arg2 : i32, i32
  }
  func.func @transform_1(%arg0: i32, %arg1: i32, %arg2: i32) -> (i32, i32) {
    %c0_i32 = arith.constant 0 : i32
    return %arg2, %arg1 : i32, i32
  }
  func.func @transform_2(%arg0: i32, %arg1: i32, %arg2: i32) -> (i32, i32) {
    %c0_i32 = arith.constant 0 : i32
    %c0_i32_0 = arith.constant 0 : i32
    return %c0_i32, %arg1 : i32, i32
  }
  func.func @transform_3(%arg0: i32, %arg1: i32, %arg2: i32) -> (i32, i32) {
    %c0_i32 = arith.constant 0 : i32
    return %arg0, %arg1 : i32, i32
  }
}

</mosaic_0001>

<bundles_post_ra>
// kernel: tpu_custom_call.1
= control target key start
LH: loop header
LB: loop body
LE: loop exit
PB: predicated region body
PF: predicated region fallthrough
CT: control target
= control target key end

     0   :  { %8 = vsyncpa [#allocation3], 0  ;;  %s246_s0 = inlined_call_operand.hbm [shape: f32[16,32], index: 0, kind: input, shape index: {}]   ;;  %s247_s1 = inlined_call_operand.hbm [shape: f32[32,64], index: 1, kind: input, shape index: {}]   ;;  %s248_s2 = inlined_call_operand.vmem [shape: f32[1,64], index: 2, kind: input, shape index: {}]   ;;  %s249_s3 = inlined_call_operand.hbm [shape: f32[16,64], index: 3, kind: output, shape index: {}]  }
   0x1   :  { %9 = vsyncpa [#allocation6], 0 }
   0x2   :  { %10 = vsyncpa [#allocation4], 0  ;;  %s15_s14 = sshll.u32 %s246_s0, 4  ;;  %s200_s15 = smov [#allocation2]   ;;  %s16_s14 = int_to_ptr.hbm [resolvable:$true] %s15_s14 }
   0x3   :  { %s17_s16 = sshll.u32 %s200_s15, 4  ;;  %s28_s19 = sshll.u32 %s247_s1, 4  ;;  %s18_s16 = int_to_ptr.vmem [resolvable:$true] %s17_s16  ;;  %s29_s19 = int_to_ptr.hbm [resolvable:$true] %s28_s19 }
   0x4   :  { %s201_s20 = smov 128   ;;  %s202_s21 = smov 8  }
   0x5   :  { %23 = dma.hbm_to_vmem [thread:$0]  %s16_s14, 256, %s18_s16, [#allocation3], %s201_s20, %s201_s20, %s202_s21  }
   0x6   :  { %s203_s22 = smov [#allocation5]  }
   0x7   :  { %s30_s23 = sshll.u32 %s203_s22, 4  ;;  %s31_s23 = int_to_ptr.vmem [resolvable:$true] %s30_s23 }
   0x8   :  { %36 = dma.hbm_to_vmem [thread:$0]  %s29_s19, 512, %s31_s23, [#allocation6], %s201_s20, %s201_s20, %s202_s21  }
   0x9   :  { %194 = dma.done.wait [#allocation3], 256  }
   0xa   :  { %195 = vsyncadd [#allocation3], 4294967040 }
   0xb   :  { %196 = dma.done.wait [#allocation6], 512  }
   0xc   :  { %197 = vsyncadd [#allocation6], 4294966784  ;;  %v52_v0 = vld [vmem:[#allocation5 + $0x18] sm:$0xff]  ;;  %v51_v1 = vld [vmem:[#allocation5 + $0x10] sm:$0xff]  ;;  %vm57_vm0 = vcmask 261120   ;;  %s204_s24 = smov [#allocation7]  }
   0xd   :  { %76 = vmatpush.msra.mxu0 %v52_v0  ;;  %112 = vmatpush.msra.mxu1 %v52_v0  ;;  %v50_v2 = vld [vmem:[#allocation5 + $0x8] sm:$0xff]  ;;  %v49_v3 = vld [vmem:[#allocation5] sm:$0xff]  ;;  %v47_v4 = vld [vmem:[#allocation2] sm:$0xff]  ;;  %s94_s25 = sshll.u32 %s204_s24, 4  ;;  %s96_s28 = sshll.u32 %s249_s3, 4  ;;  %vm87_vm1 = vcmask 523264   ;;  %s95_s25 = int_to_ptr.vmem [resolvable:$true] %s94_s25  ;;  %s97_s28 = int_to_ptr.hbm [resolvable:$true] %s96_s28 }
   0xe   :  { %v48_v5 = vld [vmem:[#allocation2 + $0x8] sm:$0xff]  ;;  %v121_v6 = vld [vmem:[%s248_s2] ss:$0 sm:$0xff] }
   0xf   :  { %77 = vmatpush.msra.mxu0 %v51_v1  ;;  %113 = vmatpush.msra.mxu1 %v51_v1 }
  0x11   :  { %78 = vmatpush.msra.mxu0 %v50_v2  ;;  %114 = vmatpush.msra.mxu1 %v50_v2 }
  0x13   :  { %79 = vmatpush.msra.mxu0 %v49_v3  ;;  %115 = vmatpush.msra.mxu1 %v49_v3 }
  0x14   :  { %110 = vmatmul.msk.f32.vlgmr.msra.gmra.mxu0 %vm57_vm0, %v47_v4  ;;  %111 = vmatmul.msk.f32.vlgmr.msra.gmra.mxu1 %vm57_vm0, %v48_v5 }
  0x91   :  { %v81_v7 = vpop.f32.mrf.mxu0  ;;  %v84_v8 = vpop.f32.mrf.mxu1 }
  0x92   :  { %v82_v9 = vadd.f32 %v121_v6, %v81_v7  ;;  %v85_v10 = vadd.f32 %v121_v6, %v84_v8 }
  0x94   :  { %88 = vst.msk [vmem:[#allocation7] sm:$0xff] %vm87_vm1, %v82_v9 }
  0x95   :  { %89 = vst.msk [vmem:[#allocation7 + $0x8] sm:$0xff] %vm87_vm1, %v85_v10 }
  0x96   :  { %102 = dma.vmem_to_hbm [thread:$0]  %s95_s25, 256, %s97_s28, [#allocation4], %s201_s20, %s201_s20, %s202_s21  }
  0x97   :  { %198 = dma.done.wait [#allocation4], 256  }
  0x98   :  { %199 = vsyncadd [#allocation4], 4294967040 }
  0x99   :  { %107 = vsyncpa [#allocation3], 1 }
  0x9a   :  { %108 = vsyncpa [#allocation6], 1 }
  0x9b   :  { %109 = vsyncpa [#allocation4], 1 }

</bundles_post_ra>
